<compile_context>
chip_gen: v7x
topology: tpu7x:2x2x1
jax: 0.10.0
libtpu: 0.0.40
codegen_flags: <defaults>
</compile_context>

<pallas_src>
import functools

import jax
import jax.numpy as jnp
from jax.experimental import pallas as pl
from jax.experimental.pallas import tpu as pltpu

BETA = 1.0
EPSILON = 1e-7


def _fbeta_partial_kernel(logits_ref, true_ref, out_ref, *,
                          total_rows, block_rows, beta, epsilon):
    """One batch tile: writes sum(fbeta) over its valid rows to out_ref[0, 0]."""
    i = pl.program_id(0)

    # Cast up once; compute everything in f32.
    y_pred = jax.nn.sigmoid(logits_ref[...].astype(jnp.float32))
    y_true = true_ref[...].astype(jnp.float32)

    # Row-wise reductions over the class axis (dim=1) -> [TB, 1].
    # Identities (module's FP/FN):  TP + FP = sum(y_true),  TP + FN = sum(y_pred)
    tp = jnp.sum(y_pred * y_true, axis=1, keepdims=True)
    s_true = jnp.sum(y_true, axis=1, keepdims=True)   # == TP + FP
    s_pred = jnp.sum(y_pred, axis=1, keepdims=True)   # == TP + FN

    eps = jnp.float32(epsilon)
    beta2 = jnp.float32(beta * beta)

    precision = tp / (s_true + eps)
    recall = tp / (s_pred + eps)
    fbeta = (1.0 + beta2) * precision * recall / (precision * beta2 + recall + eps)
    fbeta = jnp.clip(fbeta, eps, 1.0 - eps)

    # Mask rows of a padded final tile (padded block data is unspecified and
    # must not contribute to the sum).
    row = i * block_rows + jax.lax.broadcasted_iota(jnp.int32, (block_rows, 1), 0)
    fbeta = jnp.where(row < total_rows, fbeta, jnp.float32(0.0))

    out_ref[0, 0] = jnp.sum(fbeta)


def _pick_block_rows(batch, classes):
    """Largest multiple-of-8 row tile keeping ~2 MiB (f32) per pipeline buffer."""
    budget_bytes = 2 * 1024 * 1024
    rows = budget_bytes // max(1, classes * 4)
    rows = max(8, (rows // 8) * 8)
    # Block == full dim is always legal, even if not a multiple of 8.
    return batch if batch <= rows else rows


def fbeta_loss(y_logits, y_true, *, beta=BETA, epsilon=EPSILON, block_rows=None):
    """1 - mean(F_beta) over the batch.  Inputs: [B, C]; any float/int dtype."""
    B, C = y_logits.shape
    assert y_true.shape == (B, C)

    tb = block_rows if block_rows is not None else _pick_block_rows(B, C)
    num_tiles = pl.cdiv(B, tb)

    kernel = functools.partial(
        _fbeta_partial_kernel,
        total_rows=B, block_rows=tb, beta=float(beta), epsilon=float(epsilon))

    partials = pl.pallas_call(
        kernel,
        out_shape=jax.ShapeDtypeStruct((num_tiles, 1), jnp.float32),
        grid=(num_tiles,),
        in_specs=[
            pl.BlockSpec((tb, C), lambda i: (i, 0)),
            pl.BlockSpec((tb, C), lambda i: (i, 0)),
        ],
        out_specs=pl.BlockSpec((1, 1), lambda i: (i, 0),
                               memory_space=pltpu.MemorySpace.SMEM),
        compiler_params=pltpu.CompilerParams(
            dimension_semantics=("parallel",),
            vmem_limit_bytes=32 * 1024 * 1024),
    )(y_logits, y_true)

    # Finish the mean in the wrapper (multiply by 1/B instead of dividing).
    return 1.0 - jnp.sum(partials) * jnp.float32(1.0 / B)


def _fbeta_loss_ref(y_logits, y_true, *, beta=BETA, epsilon=EPSILON):
    """Pure-JAX reference mirroring the PyTorch forward() exactly."""
    y_pred = jax.nn.sigmoid(y_logits.astype(jnp.float32))
    y_true = y_true.astype(jnp.float32)
    tp = (y_pred * y_true).sum(axis=1)
    fp = ((1.0 - y_pred) * y_true).sum(axis=1)
    fn = (y_pred * (1.0 - y_true)).sum(axis=1)
    precision = tp / (tp + fp + epsilon)
    recall = tp / (tp + fn + epsilon)
    fbeta = (1.0 + beta ** 2) * precision * recall / (precision * beta ** 2 + recall + epsilon)
    fbeta = jnp.clip(fbeta, epsilon, 1.0 - epsilon)
    return 1.0 - fbeta.mean()


if __name__ == "__main__":
    key = jax.random.PRNGKey(0)
    k1, k2, k3, k4 = jax.random.split(key, 4)

    # --- Test 1: f32 inputs, single tile -------------------------------------
    B, C = 8, 128
    y_logits = jax.random.normal(k1, (B, C), dtype=jnp.float32)
    y_true = (jax.random.uniform(k2, (B, C)) > 0.5).astype(jnp.float32)

    loss = jax.block_until_ready(fbeta_loss(y_logits, y_true))
    ref = jax.block_until_ready(_fbeta_loss_ref(y_logits, y_true))
    assert jnp.allclose(loss, ref, atol=1e-4, rtol=1e-4), (loss, ref)

    # --- Test 2: bf16 inputs (HBM-byte saving path); math still f32 in-kernel -
    y_logits_bf16 = y_logits.astype(jnp.bfloat16)
    y_true_bf16 = y_true.astype(jnp.bfloat16)
    loss_bf16 = jax.block_until_ready(fbeta_loss(y_logits_bf16, y_true_bf16))
    ref_bf16 = jax.block_until_ready(_fbeta_loss_ref(y_logits_bf16, y_true_bf16))
    assert jnp.allclose(loss_bf16, ref_bf16, atol=1e-4, rtol=1e-4), (loss_bf16, ref_bf16)

    # --- Test 3: multi-tile grid with a padded final tile (B=20, TB=8) --------
    B2, C2 = 20, 256
    y_logits2 = jax.random.normal(k3, (B2, C2), dtype=jnp.float32)
    y_true2 = (jax.random.uniform(k4, (B2, C2)) > 0.5).astype(jnp.float32)
    loss2 = jax.block_until_ready(fbeta_loss(y_logits2, y_true2, block_rows=8))
    ref2 = jax.block_until_ready(_fbeta_loss_ref(y_logits2, y_true2))
    assert jnp.allclose(loss2, ref2, atol=1e-4, rtol=1e-4), (loss2, ref2)

    print("KERNEL_OK")
</pallas_src>

<mosaic_0001>
module attributes {stable_mosaic.version = 11 : i64} {
  func.func @_fbeta_partial_kernel(%arg0: i32, %arg1: memref<8x128xf32, #tpu.memory_space<vmem>>, %arg2: memref<8x128xf32, #tpu.memory_space<vmem>>, %arg3: memref<1x1xf32, #tpu.memory_space<smem>>) attributes {dimension_semantics = [#tpu.dimension_semantics<parallel>], iteration_bounds = array<i64: 1>, scalar_prefetch = 0 : i64, scratch_operands = 0 : i64, tpu.core_type = #tpu.core_type<tc>, window_params = [{transform_indices = @transform_0, window_bounds = array<i64: 8, 128>}, {transform_indices = @transform_1, window_bounds = array<i64: 8, 128>}, {transform_indices = @transform_2, window_bounds = array<i64: 1, 1>}]} {
    %c0 = arith.constant 0 : index
    %c0_0 = arith.constant 0 : index
    %0 = vector.load %arg1[%c0, %c0_0] : memref<8x128xf32, #tpu.memory_space<vmem>>, vector<8x128xf32>
    %1 = arith.negf %0 : vector<8x128xf32>
    %2 = math.exp %1 : vector<8x128xf32>
    %cst = arith.constant 1.000000e+00 : f32
    %3 = vector.broadcast %cst : f32 to vector<8x128xf32>
    %4 = arith.addf %3, %2 : vector<8x128xf32>
    %5 = arith.divf %3, %4 : vector<8x128xf32>
    %c0_1 = arith.constant 0 : index
    %c0_2 = arith.constant 0 : index
    %6 = vector.load %arg2[%c0_1, %c0_2] : memref<8x128xf32, #tpu.memory_space<vmem>>, vector<8x128xf32>
    %7 = arith.mulf %5, %6 : vector<8x128xf32>
    %cst_3 = arith.constant dense<0.000000e+00> : vector<8xf32>
    %8 = vector.multi_reduction <add>, %7, %cst_3 [1] : vector<8x128xf32> to vector<8xf32>
    %9 = vector.shape_cast %8 : vector<8xf32> to vector<8x1xf32>
    %cst_4 = arith.constant dense<0.000000e+00> : vector<8xf32>
    %10 = vector.multi_reduction <add>, %6, %cst_4 [1] : vector<8x128xf32> to vector<8xf32>
    %11 = vector.shape_cast %10 : vector<8xf32> to vector<8x1xf32>
    %cst_5 = arith.constant dense<0.000000e+00> : vector<8xf32>
    %12 = vector.multi_reduction <add>, %5, %cst_5 [1] : vector<8x128xf32> to vector<8xf32>
    %13 = vector.shape_cast %12 : vector<8xf32> to vector<8x1xf32>
    %cst_6 = arith.constant 1.000000e-07 : f32
    %14 = vector.broadcast %cst_6 : f32 to vector<8x1xf32>
    %15 = arith.addf %11, %14 : vector<8x1xf32>
    %16 = arith.divf %9, %15 : vector<8x1xf32>
    %cst_7 = arith.constant 1.000000e-07 : f32
    %17 = vector.broadcast %cst_7 : f32 to vector<8x1xf32>
    %18 = arith.addf %13, %17 : vector<8x1xf32>
    %19 = arith.divf %9, %18 : vector<8x1xf32>
    %cst_8 = arith.constant 1.000000e+00 : f32
    %cst_9 = arith.constant 1.000000e+00 : f32
    %20 = arith.addf %cst_8, %cst_9 : f32
    %21 = vector.broadcast %20 : f32 to vector<8x1xf32>
    %22 = arith.mulf %21, %16 : vector<8x1xf32>
    %23 = arith.mulf %22, %19 : vector<8x1xf32>
    %cst_10 = arith.constant 1.000000e+00 : f32
    %24 = vector.broadcast %cst_10 : f32 to vector<8x1xf32>
    %25 = arith.mulf %16, %24 : vector<8x1xf32>
    %26 = arith.addf %25, %19 : vector<8x1xf32>
    %cst_11 = arith.constant 1.000000e-07 : f32
    %27 = vector.broadcast %cst_11 : f32 to vector<8x1xf32>
    %28 = arith.addf %26, %27 : vector<8x1xf32>
    %29 = arith.divf %23, %28 : vector<8x1xf32>
    %cst_12 = arith.constant 1.000000e+00 : f32
    %cst_13 = arith.constant 1.000000e-07 : f32
    %30 = arith.subf %cst_12, %cst_13 : f32
    %cst_14 = arith.constant 1.000000e-07 : f32
    %31 = vector.broadcast %cst_14 : f32 to vector<8x1xf32>
    %32 = arith.maximumf %31, %29 : vector<8x1xf32>
    %33 = vector.broadcast %30 : f32 to vector<8x1xf32>
    %34 = arith.minimumf %33, %32 : vector<8x1xf32>
    %c8_i32 = arith.constant 8 : i32
    %35 = arith.muli %arg0, %c8_i32 : i32
    %36 = tpu.iota {dimensions = array<i32: 0>} : vector<8x1xi32>
    %37 = vector.broadcast %35 : i32 to vector<8x1xi32>
    %38 = arith.addi %37, %36 : vector<8x1xi32>
    %c8_i32_15 = arith.constant 8 : i32
    %39 = vector.broadcast %c8_i32_15 : i32 to vector<8x1xi32>
    %40 = arith.cmpi slt, %38, %39 : vector<8x1xi32>
    %cst_16 = arith.constant 0.000000e+00 : f32
    %41 = vector.broadcast %cst_16 : f32 to vector<8x1xf32>
    %42 = arith.select %40, %34, %41 : vector<8x1xi1>, vector<8x1xf32>
    %43 = vector.shape_cast %42 : vector<8x1xf32> to vector<1x8x1xf32>
    %cst_17 = arith.constant dense<0.000000e+00> : vector<1xf32>
    %44 = vector.multi_reduction <add>, %43, %cst_17 [1, 2] : vector<1x8x1xf32> to vector<1xf32>
    %45 = vector.shape_cast %44 : vector<1xf32> to vector<1x1x1xf32>
    %46 = vector.extract %45[0, 0, 0] : f32 from vector<1x1x1xf32>
    %c0_18 = arith.constant 0 : index
    %c0_19 = arith.constant 0 : index
    %47 = memref.load %arg3[%c0_18, %c0_19] : memref<1x1xf32, #tpu.memory_space<smem>>
    memref.store %46, %arg3[%c0_18, %c0_19] : memref<1x1xf32, #tpu.memory_space<smem>>
    return
  }
  func.func @transform_0(%arg0: i32) -> (i32, i32) {
    %c0_i32 = arith.constant 0 : i32
    %c0_i32_0 = arith.constant 0 : i32
    return %arg0, %c0_i32 : i32, i32
  }
  func.func @transform_1(%arg0: i32) -> (i32, i32) {
    %c0_i32 = arith.constant 0 : i32
    %c0_i32_0 = arith.constant 0 : i32
    return %arg0, %c0_i32 : i32, i32
  }
  func.func @transform_2(%arg0: i32) -> (i32, i32) {
    %c0_i32 = arith.constant 0 : i32
    %c0_i32_0 = arith.constant 0 : i32
    return %arg0, %c0_i32 : i32, i32
  }
}

</mosaic_0001>

<bundles_post_ra>
// kernel: tpu_custom_call.1
= control target key start
LH: loop header
LB: loop body
LE: loop exit
PB: predicated region body
PF: predicated region fallthrough
CT: control target
= control target key end

     0   :  { %7 = vsyncpa [#allocation3], 0  ;;  %s230_s0 = inlined_call_operand.hbm [shape: f32[8,128], index: 0, kind: input, shape index: {}]   ;;  %s231_s1 = inlined_call_operand.hbm [shape: f32[8,128], index: 1, kind: input, shape index: {}]   ;;  %s232_s2 = inlined_call_operand.hbm [shape: f32[1,1], index: 2, kind: output, shape index: {}]  }
   0x1   :  { %8 = vsyncpa [#allocation6], 0 }
   0x2   :  { %9 = vsyncpa [#allocation4], 0  ;;  %s176_s9 = smov [#allocation2]   ;;  %s177_s11 = smov [#allocation5]  }
   0x3   :  { %s16_s10 = sshll.u32 %s176_s9, 4  ;;  %s26_s12 = sshll.u32 %s177_s11, 4  ;;  %s17_s10 = int_to_ptr.vmem [resolvable:$true] %s16_s10  ;;  %s27_s12 = int_to_ptr.vmem [resolvable:$true] %s26_s12 }
   0x4   :  { %s116_s15 = scalar_lea.hbm %s230_s0, 128 }
   0x5   :  { %p117_p0 = scmp.ne.s32.totalorder %s230_s0, %s116_s15  ;;  %p120_p1 = scmp.lt.u32.totalorder %s116_s15, %s230_s0 }
   0x7   :  { %p122_p2 = pnand %p120_p1, %p117_p0 }
   0x9   :  { %125 = shalt.err (!%p122_p2)
}
   0xa   :  { %s126_s20 = scalar_lea.vmem %s17_s10, 128  ;;  %p131_p4 = scmp.lt.s32.totalorder %s17_s10, %s17_s10 }
   0xb   :  { %p127_p3 = scmp.ne.s32.totalorder %s17_s10, %s126_s20  ;;  %p132_p5 = scmp.lt.s32.totalorder %s126_s20, %s126_s20 }
   0xd   :  { %p133_p6 = por %p132_p5, %p131_p4 }
   0xf   :  { %p134_p7 = pnand %p133_p6, %p127_p3 }
  0x11   :  { %137 = shalt.err (!%p134_p7)
}
  0x12   :  { %19 = dma.hbm_to_vmem [thread:$0]  %s230_s0, 128, %s17_s10, [#allocation3]  }
  0x13   :  { %s138_s25 = scalar_lea.hbm %s231_s1, 128 }
  0x14   :  { %p139_p8 = scmp.ne.s32.totalorder %s231_s1, %s138_s25  ;;  %p142_p9 = scmp.lt.u32.totalorder %s138_s25, %s231_s1 }
  0x16   :  { %p144_p10 = pnand %p142_p9, %p139_p8 }
  0x18   :  { %147 = shalt.err (!%p144_p10)
}
  0x19   :  { %s148_s30 = scalar_lea.vmem %s27_s12, 128  ;;  %p153_p12 = scmp.lt.s32.totalorder %s27_s12, %s27_s12 }
  0x1a   :  { %p149_p11 = scmp.ne.s32.totalorder %s27_s12, %s148_s30  ;;  %p154_p13 = scmp.lt.s32.totalorder %s148_s30, %s148_s30 }
  0x1c   :  { %p155_p0 = por %p154_p13, %p153_p12 }
  0x1e   :  { %p156_p1 = pnand %p155_p0, %p149_p11 }
  0x20   :  { %159 = shalt.err (!%p156_p1)
}
  0x21   :  { %29 = dma.hbm_to_vmem [thread:$0]  %s231_s1, 128, %s27_s12, [#allocation6]  }
  0x22   :  { %170 = dma.done.wait [#allocation3], 128  }
  0x23   :  { %171 = vsyncadd [#allocation3], 4294967168 }
  0x24   :  { %172 = dma.done.wait [#allocation6], 128  }
  0x25   :  { %173 = vsyncadd [#allocation6], 4294967168  ;;  %v43_v0 = vld [vmem:[#allocation5] sm:$0xff]  ;;  %v36_v1 = vld [vmem:[#allocation2] sm:$0xff]  ;;  %vm72_vm0 = vcmask 7168   ;;  %s160_s6 = scalar_lea.hbm %s232_s2, 16 }
  0x26   :  { %47 = vadd.xlane.f32.xlu0 %v43_v0  ;;  %v100_v2 = vmul.f32 -1.442695, %v36_v1  ;;  %p161_p2 = scmp.ne.s32.totalorder %s232_s2, %s160_s6  ;;  %p164_p3 = scmp.lt.u32.totalorder %s160_s6, %s232_s2 }
  0x28   :  { %106 = vpow2.f32 %v100_v2  ;;  %p166_p4 = pnand %p164_p3, %p161_p2 }
  0x32   :  { %v107_v3 = vpop.eup %106 }
  0x33   :  { %v40_v4 = vadd.f32 1.0, %v107_v3 }
  0x35   :  { %108 = vrcp.f32 %v40_v4 }
  0x3f   :  { %v109_v5 = vpop.eup %108 }
  0x40   :  { %49 = vadd.xlane.f32.xlu0 %v109_v5  ;;  %v44_v6 = vmul.f32 %v109_v5, %v43_v0 }
  0x42   :  { %45 = vadd.xlane.f32.xlu1 %v44_v6 }
  0xb3   :  { %v48_v7 = vpop.xlane.xlu0 %47 }
  0xb4   :  { %v51_v8 = vadd.f32 1e-07, %v48_v7 }
  0xb6   :  { %110 = vrcp.f32 %v51_v8 }
  0xc0   :  { %v111_v11 = vpop.eup %110 }
  0xcd   :  { %v50_v9 = vpop.xlane.xlu0 %49 }
  0xce   :  { %v54_v10 = vadd.f32 1e-07, %v50_v9 }
  0xcf   :  { %v46_v12 = vpop.xlane.xlu1 %45 }
  0xd0   :  { %112 = vrcp.f32 %v54_v10  ;;  %v53_v14 = vmul.f32 %v111_v11, %v46_v12 }
  0xd2   :  { %v57_v18 = vmul.f32 2.0, %v53_v14 }
  0xda   :  { %v113_v13 = vpop.eup %112 }
  0xdb   :  { %v56_v15 = vmul.f32 %v113_v13, %v46_v12 }
  0xdd   :  { %v59_v16 = vadd.f32 %v56_v15, %v53_v14  ;;  %v58_v19 = vmul.f32 %v57_v18, %v56_v15 }
  0xdf   :  { %v60_v17 = vadd.f32 1e-07, %v59_v16 }
  0xe1   :  { %114 = vrcp.f32 %v60_v17 }
  0xeb   :  { %v115_v20 = vpop.eup %114 }
  0xec   :  { %v62_v21 = vmul.f32 %v115_v20, %v58_v19 }
  0xee   :  { %v63_v22 = vmax.f32 %v62_v21, 1e-07 }
  0xf0   :  { %v64_v23 = vmin.f32 %v63_v22, 0.9999999 }
  0xf2   :  { %v73_v24 = vsel %vm72_vm0, %v64_v23, 0.0 }
  0xf3   :  { %74 = vadd.xlane.f32.xlu1 %v73_v24 }
 0x180   :  { %v75_v25 = vpop.xlane.xlu1 %74 }
 0x181   :  { %v76_v26 = vrot.slane %v75_v25, 4 }
 0x183   :  { %v77_v27 = vadd.f32 %v76_v26, %v75_v25 }
 0x185   :  { %v78_v28 = vrot.slane %v77_v27, 2 }
 0x187   :  { %v79_v29 = vadd.f32 %v78_v28, %v77_v27 }
 0x189   :  { %v80_v30 = vrot.slane %v79_v29, 1 }
 0x18b   :  { %v81_v31 = vadd.f32 %v80_v30, %v79_v29 }
 0x18d   :  { %101 = vpush %v81_v31 }
 0x1be   :  { %s102_s1 = spop %101 }
 0x1bf   :  { %84 = sst [smem:[#allocation7]] %s102_s1 }
 0x1c0   :  { %169 = shalt.err (!%p166_p4)
}
 0x1c1   :  { %s178_s11 = smov [#allocation7]  }
 0x1c2   :  { %92 = dma.smem_to_hbm %s178_s11, 16, %s232_s2, [#allocation4]  }
 0x1c3   :  { %174 = dma.done.wait [#allocation4], 16  }
 0x1c4   :  { %175 = vsyncadd [#allocation4], 4294967280 }
 0x1c5   :  { %96 = sfence }
 0x1c6   :  { %97 = vsyncpa [#allocation3], 1 }
 0x1c7   :  { %98 = vsyncpa [#allocation6], 1 }
 0x1c8   :  { %99 = vsyncpa [#allocation4], 1 }

</bundles_post_ra>
